<compile_context>
chip_gen: v5e
topology: v5e:2x2
jax: 0.10.0
libtpu: 0.0.40
codegen_flags: <defaults>
</compile_context>

<pallas_src>
import jax
import jax.numpy as jnp
from jax.experimental import pallas as pl
from jax.experimental.pallas import tpu as pltpu


def _au_classifier_kernel(x_ref, wsel_ref, b_ref, o_ref):
    # x_ref:    (TB, T*C)  flattened (t, c) rows for TB batch elements
    # wsel_ref: (T*C, T)   block-diagonal selector with fc.weight folded in
    # b_ref:    (1, T)     bias
    # o_ref:    (TB, T)    output block
    out = jnp.dot(x_ref[...], wsel_ref[...],
                  preferred_element_type=jnp.float32)      # MXU, f32 accumulation
    o_ref[...] = (out + b_ref[...].astype(jnp.float32)).astype(o_ref.dtype)


def _device_kind() -> str:
    try:
        return jax.devices()[0].device_kind.lower()
    except Exception:  # no device info available; fall back to conservative defaults
        return ""


def au_classifier(seq_input, weight, bias, *, block_b=None):
    """seq_input: (B, T, C); weight: (T, C) == fc.weight (requires T == out_channels);
    bias: (T,). Returns (B, T) in seq_input.dtype."""
    B, T, C = seq_input.shape
    assert weight.shape == (T, C)
    assert bias.shape == (T,)
    dtype = seq_input.dtype
    itemsize = jnp.dtype(dtype).itemsize

    kind = _device_kind()
    is_v5 = "v5" in kind
    multi_tc = "v7" in kind  # 2 TensorCores per chip

    # ---- Batch tile sizing (the main lever: amortize per-step overhead). ----
    if block_b is None:
        block_b = 4096 if is_v5 else 8192
    TB = min(block_b, B)
    if TB < B:
        TB = max(8, (TB // 8) * 8)          # sublane-aligned when not the full batch
    # On multi-TC chips keep >= 2 grid steps so the "parallel" batch axis can
    # shard across both TensorCores.
    if multi_tc and B > 8 and pl.cdiv(B, TB) < 2:
        TB = min(B, ((-(-B // 2) + 7) // 8) * 8)   # ceil(B/2) rounded up to mult of 8
    grid_b = pl.cdiv(B, TB)

    # ---- VMEM budget (double-buffered x + lane-padded out + resident consts). ----
    lane = 128
    out_cols_padded = ((T + lane - 1) // lane) * lane
    x_block_bytes = TB * T * C * itemsize
    out_block_bytes = TB * out_cols_padded * itemsize      # (TB, T) pads to 128 lanes
    wsel_bytes = (T * C) * out_cols_padded * itemsize
    bias_bytes = 8 * out_cols_padded * itemsize
    need = 2 * (x_block_bytes + out_block_bytes) + 2 * (wsel_bytes + bias_bytes)
    vmem_cap = (48 << 20) if multi_tc else (100 << 20)     # v7x: 64 MiB physical
    vmem_limit = int(min(max(32 << 20, int(need * 1.25) + (2 << 20)), vmem_cap))

    # ---- Layout plumbing (free, contiguous row-major reshapes). ----
    x2d = seq_input.reshape(B, T * C)                      # (B, T*C) lane-dense rows
    b2d = bias.reshape(1, T).astype(dtype)                 # (1, T)

    # Block-diagonal selector with the weight folded in:
    #   wsel[t*C + c, t'] = weight[t, c] if t == t' else 0
    t_ids = jnp.repeat(jnp.arange(T, dtype=jnp.int32), C)                     # (T*C,)
    mask = t_ids[:, None] == jnp.arange(T, dtype=jnp.int32)[None, :]          # (T*C, T)
    wsel = jnp.where(mask, weight.reshape(T * C, 1), 0).astype(dtype)         # (T*C, T)

    # NOTE: out_shape is exactly (B, T); Pallas masks the tail writeback when
    # B is not a multiple of TB — keep this invariant.
    # TODO(synk): optional G=16 lane-dense packed output (unmasked 128-lane stores)
    # for v6e/v7x; skipped here to keep the (B, T) output layout 1:1 with PyTorch.
    return pl.pallas_call(
        _au_classifier_kernel,
        out_shape=jax.ShapeDtypeStruct((B, T), dtype),
        grid_spec=pltpu.PrefetchScalarGridSpec(
            num_scalar_prefetch=0,
            grid=(grid_b,),
            in_specs=[
                pl.BlockSpec((TB, T * C), lambda i: (i, 0)),   # x: TB rows per step
                pl.BlockSpec((T * C, T), lambda i: (0, 0)),    # weight-selector: resident
                pl.BlockSpec((1, T), lambda i: (0, 0)),        # bias: resident
            ],
            out_specs=pl.BlockSpec((TB, T), lambda i: (i, 0)),
        ),
        compiler_params=pltpu.CompilerParams(
            dimension_semantics=("parallel",),
            vmem_limit_bytes=vmem_limit,
        ),
    )(x2d, wsel, b2d)


if __name__ == "__main__":
    key = jax.random.PRNGKey(0)
    kx, kw, kb, kx2 = jax.random.split(key, 4)

    T, C = 8, 32                       # seq_len == out_channels, in_channels
    bound = 1.0 / (C ** 0.5)           # mimic nn.Linear default init range
    weight = jax.random.uniform(kw, (T, C), jnp.float32, -bound, bound)
    bias = jax.random.uniform(kb, (T,), jnp.float32, -bound, bound)

    def reference(x):
        return jnp.einsum("btc,tc->bt", x, weight) + bias[None, :]

    # Case 1: small batch, single block (or 2 blocks on multi-TC chips).
    x_small = jax.random.normal(kx, (16, T, C), jnp.float32)
    out_small = jax.block_until_ready(au_classifier(x_small, weight, bias))
    assert out_small.shape == (16, T)
    assert jnp.allclose(out_small, reference(x_small), atol=1e-4, rtol=1e-4)

    # Case 2: multiple batch tiles incl. a ragged tail (exercises tiled grid path).
    x_big = jax.random.normal(kx2, (192, T, C), jnp.float32)
    out_big = jax.block_until_ready(au_classifier(x_big, weight, bias, block_b=64))
    assert out_big.shape == (192, T)
    assert jnp.allclose(out_big, reference(x_big), atol=1e-4, rtol=1e-4)

    print("KERNEL_OK")
</pallas_src>

<mosaic_0001>
module attributes {stable_mosaic.version = 11 : i64} {
  func.func @_au_classifier_kernel(%arg0: i32, %arg1: memref<16x256xf32, #tpu.memory_space<vmem>>, %arg2: memref<256x8xf32, #tpu.memory_space<vmem>>, %arg3: memref<1x8xf32, #tpu.memory_space<vmem>>, %arg4: memref<16x8xf32, #tpu.memory_space<vmem>>) attributes {dimension_semantics = [#tpu.dimension_semantics<parallel>], iteration_bounds = array<i64: 1>, scalar_prefetch = 0 : i64, scratch_operands = 0 : i64, tpu.core_type = #tpu.core_type<tc>, window_params = [{transform_indices = @transform_0, window_bounds = array<i64: 16, 256>}, {pipeline_mode = #tpu.pipeline_mode<synchronous>, transform_indices = @transform_1, window_bounds = array<i64: 256, 8>}, {pipeline_mode = #tpu.pipeline_mode<synchronous>, transform_indices = @transform_2, window_bounds = array<i64: 1, 8>}, {transform_indices = @transform_3, window_bounds = array<i64: 16, 8>}]} {
    %c0 = arith.constant 0 : index
    %c0_0 = arith.constant 0 : index
    %0 = vector.load %arg1[%c0, %c0_0] : memref<16x256xf32, #tpu.memory_space<vmem>>, vector<16x256xf32>
    %c0_1 = arith.constant 0 : index
    %c0_2 = arith.constant 0 : index
    %1 = vector.load %arg2[%c0_1, %c0_2] : memref<256x8xf32, #tpu.memory_space<vmem>>, vector<256x8xf32>
    %cst = arith.constant dense<0.000000e+00> : vector<16x8xf32>
    %2 = tpu.matmul %0, %1, %cst {dimension_numbers = #tpu.dot_dimension_numbers<[1], [0], [0], [1], [0, 0, 1, 1], [], []>} : vector<16x256xf32>, vector<256x8xf32>, vector<16x8xf32> -> vector<16x8xf32>
    %c0_3 = arith.constant 0 : index
    %c0_4 = arith.constant 0 : index
    %3 = vector.load %arg3[%c0_3, %c0_4] : memref<1x8xf32, #tpu.memory_space<vmem>>, vector<1x8xf32>
    %4 = vector.broadcast %3 : vector<1x8xf32> to vector<16x8xf32>
    %5 = arith.addf %2, %4 : vector<16x8xf32>
    %c0_5 = arith.constant 0 : index
    %c0_6 = arith.constant 0 : index
    %6 = vector.load %arg4[%c0_5, %c0_6] : memref<16x8xf32, #tpu.memory_space<vmem>>, vector<16x8xf32>
    tpu.vector_store %arg4[%c0_5, %c0_6], %5 {strides = array<i32>} : memref<16x8xf32, #tpu.memory_space<vmem>>, vector<16x8xf32>,
    return
  }
  func.func @transform_0(%arg0: i32) -> (i32, i32) {
    %c0_i32 = arith.constant 0 : i32
    %c0_i32_0 = arith.constant 0 : i32
    return %arg0, %c0_i32 : i32, i32
  }
  func.func @transform_1(%arg0: i32) -> (i32, i32) {
    %c0_i32 = arith.constant 0 : i32
    %c0_i32_0 = arith.constant 0 : i32
    %c0_i32_1 = arith.constant 0 : i32
    return %c0_i32, %c0_i32_0 : i32, i32
  }
  func.func @transform_2(%arg0: i32) -> (i32, i32) {
    %c0_i32 = arith.constant 0 : i32
    %c0_i32_0 = arith.constant 0 : i32
    %c0_i32_1 = arith.constant 0 : i32
    return %c0_i32, %c0_i32_0 : i32, i32
  }
  func.func @transform_3(%arg0: i32) -> (i32, i32) {
    %c0_i32 = arith.constant 0 : i32
    %c0_i32_0 = arith.constant 0 : i32
    return %arg0, %c0_i32 : i32, i32
  }
}

</mosaic_0001>

<bundles_post_ra>
// kernel: tpu_custom_call.1
= control target key start
LH: loop header
LB: loop body
LE: loop exit
PB: predicated region body
PF: predicated region fallthrough
CT: control target
= control target key end

     0   :  { %vm100_vm0 = vcmask 64512   ;;  %s277_s1 = inlined_call_operand.vmem [shape: f32[256,8], index: 1, kind: input, shape index: {}]   ;;  %s278_s2 = inlined_call_operand.vmem [shape: f32[1,8], index: 2, kind: input, shape index: {}]   ;;  %s279_s0 = inlined_call_operand.vmem [shape: f32[16,256], index: 0, kind: input, shape index: {}]   ;;  %s280_s3 = inlined_call_operand.vmem [shape: f32[16,8], index: 3, kind: output, shape index: {}]  }
   0x1   :  { %v33_v0 = vld [vmem:[%s277_s1 + $0x78] sm:$0xff]  ;;  %v32_v1 = vld [vmem:[%s277_s1 + $0x70] sm:$0xff]  ;;  %v31_v4 = vld [vmem:[%s277_s1 + $0x68] sm:$0xff] }
   0x2   :  { %v49_v2 = vld [vmem:[%s277_s1 + $0xf8] sm:$0xff]  ;;  %107 = vmatpush.msra.mxu2 %v33_v0  ;;  %v48_v3 = vld [vmem:[%s277_s1 + $0xf0] sm:$0xff]  ;;  %54 = vmatpush.msra.mxu0 %v33_v0  ;;  %v47_v5 = vld [vmem:[%s277_s1 + $0xe8] sm:$0xff] }
   0x3   :  { %123 = vmatpush.msra.mxu3 %v49_v2  ;;  %77 = vmatpush.msra.mxu1 %v49_v2  ;;  %v30_v6 = vld [vmem:[%s277_s1 + $0x60] sm:$0xff]  ;;  %v29_v8 = vld [vmem:[%s277_s1 + $0x58] sm:$0xff]  ;;  %v28_v10 = vld [vmem:[%s277_s1 + $0x50] sm:$0xff] }
   0x4   :  { %108 = vmatpush.msra.mxu2 %v32_v1  ;;  %55 = vmatpush.msra.mxu0 %v32_v1  ;;  %v46_v7 = vld [vmem:[%s277_s1 + $0xe0] sm:$0xff]  ;;  %v45_v9 = vld [vmem:[%s277_s1 + $0xd8] sm:$0xff]  ;;  %v44_v11 = vld [vmem:[%s277_s1 + $0xd0] sm:$0xff] }
   0x5   :  { %124 = vmatpush.msra.mxu3 %v48_v3  ;;  %78 = vmatpush.msra.mxu1 %v48_v3  ;;  %v27_v12 = vld [vmem:[%s277_s1 + $0x48] sm:$0xff]  ;;  %v26_v14 = vld [vmem:[%s277_s1 + $0x40] sm:$0xff]  ;;  %v25_v16 = vld [vmem:[%s277_s1 + $0x38] sm:$0xff] }
   0x6   :  { %109 = vmatpush.msra.mxu2 %v31_v4  ;;  %56 = vmatpush.msra.mxu0 %v31_v4  ;;  %v43_v13 = vld [vmem:[%s277_s1 + $0xc8] sm:$0xff]  ;;  %v42_v15 = vld [vmem:[%s277_s1 + $0xc0] sm:$0xff]  ;;  %v41_v17 = vld [vmem:[%s277_s1 + $0xb8] sm:$0xff] }
   0x7   :  { %125 = vmatpush.msra.mxu3 %v47_v5  ;;  %79 = vmatpush.msra.mxu1 %v47_v5  ;;  %v24_v18 = vld [vmem:[%s277_s1 + $0x30] sm:$0xff]  ;;  %v23_v20 = vld [vmem:[%s277_s1 + $0x28] sm:$0xff]  ;;  %v22_v22 = vld [vmem:[%s277_s1 + $0x20] sm:$0xff] }
   0x8   :  { %110 = vmatpush.msra.mxu2 %v30_v6  ;;  %57 = vmatpush.msra.mxu0 %v30_v6  ;;  %v40_v19 = vld [vmem:[%s277_s1 + $0xb0] sm:$0xff]  ;;  %v39_v21 = vld [vmem:[%s277_s1 + $0xa8] sm:$0xff]  ;;  %v38_v23 = vld [vmem:[%s277_s1 + $0xa0] sm:$0xff] }
   0x9   :  { %126 = vmatpush.msra.mxu3 %v46_v7  ;;  %80 = vmatpush.msra.mxu1 %v46_v7  ;;  %v21_v24 = vld [vmem:[%s277_s1 + $0x18] sm:$0xff]  ;;  %v20_v26 = vld [vmem:[%s277_s1 + $0x10] sm:$0xff]  ;;  %v19_v28 = vld [vmem:[%s277_s1 + $0x8] sm:$0xff] }
   0xa   :  { %111 = vmatpush.msra.mxu2 %v29_v8  ;;  %58 = vmatpush.msra.mxu0 %v29_v8  ;;  %v37_v25 = vld [vmem:[%s277_s1 + $0x98] sm:$0xff]  ;;  %v36_v27 = vld [vmem:[%s277_s1 + $0x90] sm:$0xff]  ;;  %v35_v29 = vld [vmem:[%s277_s1 + $0x88] sm:$0xff] }
   0xb   :  { %127 = vmatpush.msra.mxu3 %v45_v9  ;;  %81 = vmatpush.msra.mxu1 %v45_v9  ;;  %v18_v30 = vld [vmem:[%s277_s1] sm:$0xff]  ;;  %v16_v32 = vld [vmem:[%s279_s0 + $0x10] sm:$0xff]  ;;  %v17_v33 = vld [vmem:[%s279_s0 + $0x18] sm:$0xff] }
   0xc   :  { %112 = vmatpush.msra.mxu2 %v28_v10  ;;  %59 = vmatpush.msra.mxu0 %v28_v10  ;;  %v34_v31 = vld [vmem:[%s277_s1 + $0x80] sm:$0xff]  ;;  %v15_v35 = vld [vmem:[%s279_s0 + $0x8] sm:$0xff] }
   0xd   :  { %128 = vmatpush.msra.mxu3 %v44_v11  ;;  %82 = vmatpush.msra.mxu1 %v44_v11  ;;  %v14_v34 = vld [vmem:[%s279_s0] sm:$0xff] }
   0xe   :  { %113 = vmatpush.msra.mxu2 %v27_v12  ;;  %60 = vmatpush.msra.mxu0 %v27_v12  ;;  %v139_v36 = vld [vmem:[%s278_s2] ss:$0 sm:$0xff] }
   0xf   :  { %129 = vmatpush.msra.mxu3 %v43_v13  ;;  %83 = vmatpush.msra.mxu1 %v43_v13 }
  0x10   :  { %114 = vmatpush.msra.mxu2 %v26_v14  ;;  %61 = vmatpush.msra.mxu0 %v26_v14 }
  0x11   :  { %130 = vmatpush.msra.mxu3 %v42_v15  ;;  %84 = vmatpush.msra.mxu1 %v42_v15 }
  0x12   :  { %115 = vmatpush.msra.mxu2 %v25_v16  ;;  %62 = vmatpush.msra.mxu0 %v25_v16 }
  0x13   :  { %131 = vmatpush.msra.mxu3 %v41_v17  ;;  %85 = vmatpush.msra.mxu1 %v41_v17 }
  0x14   :  { %116 = vmatpush.msra.mxu2 %v24_v18  ;;  %63 = vmatpush.msra.mxu0 %v24_v18 }
  0x15   :  { %132 = vmatpush.msra.mxu3 %v40_v19  ;;  %86 = vmatpush.msra.mxu1 %v40_v19 }
  0x16   :  { %117 = vmatpush.msra.mxu2 %v23_v20  ;;  %64 = vmatpush.msra.mxu0 %v23_v20 }
  0x17   :  { %133 = vmatpush.msra.mxu3 %v39_v21  ;;  %87 = vmatpush.msra.mxu1 %v39_v21 }
  0x18   :  { %118 = vmatpush.msra.mxu2 %v22_v22  ;;  %65 = vmatpush.msra.mxu0 %v22_v22 }
  0x19   :  { %134 = vmatpush.msra.mxu3 %v38_v23  ;;  %88 = vmatpush.msra.mxu1 %v38_v23 }
  0x1a   :  { %119 = vmatpush.msra.mxu2 %v21_v24  ;;  %66 = vmatpush.msra.mxu0 %v21_v24 }
  0x1b   :  { %135 = vmatpush.msra.mxu3 %v37_v25  ;;  %89 = vmatpush.msra.mxu1 %v37_v25 }
  0x1c   :  { %120 = vmatpush.msra.mxu2 %v20_v26  ;;  %67 = vmatpush.msra.mxu0 %v20_v26 }
  0x1d   :  { %136 = vmatpush.msra.mxu3 %v36_v27  ;;  %90 = vmatpush.msra.mxu1 %v36_v27 }
  0x1e   :  { %121 = vmatpush.msra.mxu2 %v19_v28  ;;  %68 = vmatpush.msra.mxu0 %v19_v28 }
  0x1f   :  { %137 = vmatpush.msra.mxu3 %v35_v29  ;;  %91 = vmatpush.msra.mxu1 %v35_v29 }
  0x20   :  { %122 = vmatpush.msra.mxu2 %v18_v30  ;;  %69 = vmatpush.msra.mxu0 %v18_v30 }
  0x21   :  { %138 = vmatpush.msra.mxu3 %v34_v31  ;;  %73 = vmatmul.f32.vlgmr.msra.gmra.mxu2 %v16_v32 }
  0x22   :  { %96 = vmatmul.f32.vlgmr.msra.gmra.mxu3 %v17_v33  ;;  %92 = vmatpush.msra.mxu1 %v34_v31 }
  0x23   :  { %70 = vmatmul.f32.vlgmr.msra.gmra.mxu0 %v14_v34  ;;  %93 = vmatmul.f32.vlgmr.msra.gmra.mxu1 %v15_v35 }
  0xa0   :  { %v71_v37 = vpop.f32.mrf.mxu0  ;;  %v94_v38 = vpop.f32.mrf.mxu1 }
  0xa1   :  { %v72_v39 = vadd.f32 %v139_v36, %v71_v37 }
  0xa3   :  { %v95_v40 = vadd.f32 %v94_v38, %v72_v39 }
  0xa4   :  { %v74_v41 = vpop.f32.mrf.mxu2 }
  0xa5   :  { %v97_v42 = vpop.f32.mrf.mxu3  ;;  %v75_v43 = vadd.f32 %v139_v36, %v74_v41  ;;  %101 = vst.msk [vmem:[%s280_s3] sm:$0xff] %vm100_vm0, %v95_v40 }
  0xa7   :  { %v98_v44 = vadd.f32 %v97_v42, %v75_v43 }
  0xa9   :  { %102 = vst.msk [vmem:[%s280_s3 + $0x8] sm:$0xff] %vm100_vm0, %v98_v44 }

</bundles_post_ra>
